<compile_context>
chip_gen: v6e
topology: v6e:2x2x1
jax: 0.10.0
libtpu: 0.0.40
codegen_flags: <defaults>
</compile_context>

<pallas_src>
import jax
import jax.numpy as jnp
from jax import lax
from jax.experimental import pallas as pl
from jax.experimental.pallas import tpu as pltpu

LANE = 128
BN_EPS = 1e-5
LRELU_SLOPE = 0.2


def _round_up(x, m):
    return (x + m - 1) // m * m


def _vmem_limit_bytes():
    # Generation-aware scoped-VMEM budget: ~72 MiB on 128 MiB parts (v5e/v6e),
    # ~36 MiB on 64 MiB parts (v7x).  Conservative 64 MiB capacity fallback.
    try:
        cap = int(pltpu.get_tpu_info().vmem_capacity_bytes)
    except Exception:
        cap = 64 * 1024 * 1024
    return max(32 * 1024 * 1024, min(cap * 9 // 16, 96 * 1024 * 1024))


def _pick_rows(m, target=1024):
    # Largest multiple-of-8 divisor of m that is <= target; prefer >= 2 tiles
    # so both v7x TensorCores get work on the normalize pass.
    target = min(target, max(8, m // 2))
    best = m
    for d in range(8, target + 1, 8):
        if m % d == 0:
            best = d
    return best


# --------------------- conv (tap matmuls) + batch stats ---------------------

def conv_and_stats(planes, w_taps, Ho, Wo):
    """planes: 4x (N, Ho+1, Wo+1, Cin) bf16 phase-split padded input.
       w_taps: (KH, KW, Cin, Cp) bf16.
       Returns y (N*Ho*Wo, Cp) bf16 and per-step stats (N*Ho, 2, Cp) f32."""
    N, HoP, WoP, Cin = planes[0].shape
    KH, KW, _, Cp = w_taps.shape

    def kernel(p00_ref, p01_ref, p10_ref, p11_ref, w_ref, y_ref, stats_ref):
        h = pl.program_id(1)
        plane_refs = ((p00_ref, p01_ref), (p10_ref, p11_ref))
        acc = jnp.zeros((Wo, Cp), jnp.float32)
        for kh in range(KH):
            ph, dh = kh % 2, kh // 2
            rows = [plane_refs[ph][pw][h + dh] for pw in range(2)]  # (WoP, Cin)
            for kw in range(KW):
                pw, dw = kw % 2, kw // 2
                lhs = rows[pw][dw:dw + Wo, :]                       # (Wo, Cin)
                acc = acc + jnp.dot(lhs, w_ref[kh, kw],
                                    preferred_element_type=jnp.float32)
        y_ref[...] = acc.astype(y_ref.dtype)
        # Per-step partial BatchNorm statistics (no concat, no accumulator, so
        # both grid axes remain "parallel").
        stats_ref[0:1, :] = jnp.sum(acc, axis=0, keepdims=True)
        stats_ref[1:2, :] = jnp.sum(acc * acc, axis=0, keepdims=True)

    plane_spec = pl.BlockSpec((None, HoP, WoP, Cin), lambda n, h: (n, 0, 0, 0))
    return pl.pallas_call(
        kernel,
        out_shape=(jax.ShapeDtypeStruct((N * Ho * Wo, Cp), jnp.bfloat16),
                   jax.ShapeDtypeStruct((N * Ho, 2, Cp), jnp.float32)),
        grid_spec=pltpu.PrefetchScalarGridSpec(
            num_scalar_prefetch=0,
            grid=(N, Ho),
            in_specs=[plane_spec, plane_spec, plane_spec, plane_spec,
                      pl.BlockSpec((KH, KW, Cin, Cp),
                                   lambda n, h: (0, 0, 0, 0))],
            out_specs=[pl.BlockSpec((Wo, Cp), lambda n, h: (n * Ho + h, 0)),
                       pl.BlockSpec((None, 2, Cp),
                                    lambda n, h: (n * Ho + h, 0, 0))]),
        compiler_params=pltpu.CompilerParams(
            dimension_semantics=("parallel", "parallel"),
            vmem_limit_bytes=_vmem_limit_bytes()),
    )(*planes, w_taps)


# --------------------------- BatchNorm + LeakyReLU ---------------------------

def bn_lrelu(y2d, scale, shift, Cout, tile_rows):
    """y2d: (M, Cp) bf16, scale/shift: (1, Cp) f32 (pre-folded BN affine).
       Writes only the Cout real channels in f32."""
    M, Cp = y2d.shape

    def kernel(y_ref, scale_ref, shift_ref, o_ref):
        z = y_ref[...].astype(jnp.float32) * scale_ref[...] + shift_ref[...]
        z = jnp.where(z > 0, z, LRELU_SLOPE * z)
        o_ref[...] = z[:, :Cout].astype(o_ref.dtype)

    param_spec = pl.BlockSpec((1, Cp), lambda i: (0, 0))
    return pl.pallas_call(
        kernel,
        out_shape=jax.ShapeDtypeStruct((M, Cout), jnp.float32),
        grid_spec=pltpu.PrefetchScalarGridSpec(
            num_scalar_prefetch=0,
            grid=(M // tile_rows,),
            in_specs=[pl.BlockSpec((tile_rows, Cp), lambda i: (i, 0)),
                      param_spec, param_spec],
            out_specs=pl.BlockSpec((tile_rows, Cout), lambda i: (i, 0))),
        compiler_params=pltpu.CompilerParams(
            dimension_semantics=("parallel",),
            vmem_limit_bytes=_vmem_limit_bytes()),
    )(y2d, scale, shift)


# ------------------------------ UNetDown forward ----------------------------

def unet_down(x, weight, gamma, beta):
    """x: (N, C_in, H, W) NCHW f32.  weight: (C_out, C_in, 4, 4) OIHW.
    Returns (N, C_out, H//2, W//2) f32: Conv -> BatchNorm(train) -> LeakyReLU."""
    N, Cin, H, W = x.shape
    Cout, _, KH, KW = weight.shape
    stride, pad = 2, 1
    assert (KH, KW) == (4, 4)
    Ho = (H + 2 * pad - KH) // stride + 1
    Wo = (W + 2 * pad - KW) // stride + 1
    assert Wo % 8 == 0, "output row tile needs Wo % 8 == 0 (UNet spatial dims)"
    M = N * Ho * Wo

    # 128-lane channel padding; 256 only for layers wide/deep enough to be
    # MXU-bound on v6e/v7x (2x256^2 MXU).
    lane = 256 if (Cout >= 128 and Cin >= 128) else LANE
    Cp = _round_up(Cout, lane)

    # ---- cheap, input-sized XLA prep: pad + stride-2 parity phase split ----
    # (replaces the old 4x-duplicated im2col; the kernel reads these directly)
    x_nhwc = jnp.transpose(x, (0, 2, 3, 1)).astype(jnp.bfloat16)
    x_p = jnp.pad(x_nhwc, ((0, 0), (pad, pad), (pad, pad), (0, 0)))
    planes = tuple(
        x_p[:, ph::stride, pw::stride, :][:, :Ho + 1, :Wo + 1, :]
        for ph in range(stride) for pw in range(stride))   # 4x (N,Ho+1,Wo+1,Cin)

    w_taps = jnp.transpose(weight, (2, 3, 1, 0))            # (KH, KW, Cin, Cout)
    w_taps = jnp.pad(w_taps, ((0, 0), (0, 0), (0, 0), (0, Cp - Cout)))
    w_taps = w_taps.astype(jnp.bfloat16)

    # ---- fused conv (16 tap matmuls, MXU) + per-channel partial stats ----
    y, stats = conv_and_stats(planes, w_taps, Ho, Wo)

    # ---- finish BatchNorm batch statistics (tiny reduce in XLA) ----
    sums = jnp.sum(stats, axis=0)                           # (2, Cp) f32
    mean = sums[0] / M
    # NOTE: E[x^2] - E[x]^2 in f32; clamp guards tiny negative residuals.
    var = jnp.maximum(sums[1] / M - mean * mean, 0.0)       # biased var (PyTorch fwd)
    inv = lax.rsqrt(var + BN_EPS)
    gamma_p = jnp.pad(gamma.astype(jnp.float32), (0, Cp - Cout))
    beta_p = jnp.pad(beta.astype(jnp.float32), (0, Cp - Cout))
    scale = (gamma_p * inv).reshape(1, Cp)
    shift = (beta_p - mean * gamma_p * inv).reshape(1, Cp)

    # ---- normalize + affine + LeakyReLU (Pallas elementwise, Cout only) ----
    out = bn_lrelu(y, scale, shift, Cout, _pick_rows(M))

    # Module boundary is NCHW f32; a chained UNet would keep (M, C) and skip
    # this transpose entirely.
    out = out.reshape(N, Ho, Wo, Cout)
    return jnp.transpose(out, (0, 3, 1, 2))


# ---------------------------------- main ------------------------------------

def _reference(x, weight, gamma, beta):
    y = lax.conv_general_dilated(
        x, weight, window_strides=(2, 2), padding=((1, 1), (1, 1)),
        dimension_numbers=('NCHW', 'OIHW', 'NCHW'))
    mean = jnp.mean(y, axis=(0, 2, 3), keepdims=True)
    var = jnp.mean((y - mean) ** 2, axis=(0, 2, 3), keepdims=True)
    z = (y - mean) / jnp.sqrt(var + BN_EPS)
    z = z * gamma[None, :, None, None] + beta[None, :, None, None]
    return jnp.where(z > 0, z, LRELU_SLOPE * z)


if __name__ == "__main__":
    key = jax.random.PRNGKey(0)
    kx, kw = jax.random.split(key)

    N, Cin, H, W = 2, 4, 16, 16
    Cout = 8

    x = jax.random.normal(kx, (N, Cin, H, W), dtype=jnp.float32)
    weight = 0.1 * jax.random.normal(kw, (Cout, Cin, 4, 4), dtype=jnp.float32)
    gamma = jnp.ones((Cout,), dtype=jnp.float32)   # BatchNorm2d default affine
    beta = jnp.zeros((Cout,), dtype=jnp.float32)

    out = jax.block_until_ready(jax.jit(unet_down)(x, weight, gamma, beta))
    ref = _reference(x, weight, gamma, beta)

    assert out.shape == (N, Cout, H // 2, W // 2)
    # bf16 matmul operands / bf16 intermediate y -> relaxed tolerance vs f32 ref.
    assert jnp.allclose(out, ref, atol=5e-2, rtol=5e-2), float(
        jnp.max(jnp.abs(out - ref)))
    print("KERNEL_OK")
</pallas_src>

<mosaic_0001>
module attributes {stable_mosaic.version = 11 : i64} {
  func.func @kernel(%arg0: i32, %arg1: i32, %arg2: memref<1x9x9x4xbf16, #tpu.memory_space<vmem>>, %arg3: memref<1x9x9x4xbf16, #tpu.memory_space<vmem>>, %arg4: memref<1x9x9x4xbf16, #tpu.memory_space<vmem>>, %arg5: memref<1x9x9x4xbf16, #tpu.memory_space<vmem>>, %arg6: memref<4x4x4x128xbf16, #tpu.memory_space<vmem>>, %arg7: memref<8x128xbf16, #tpu.memory_space<vmem>>, %arg8: memref<1x2x128xf32, #tpu.memory_space<vmem>>) attributes {dimension_semantics = [#tpu.dimension_semantics<parallel>, #tpu.dimension_semantics<parallel>], iteration_bounds = array<i64: 2, 8>, scalar_prefetch = 0 : i64, scratch_operands = 0 : i64, tpu.core_type = #tpu.core_type<tc>, window_params = [{transform_indices = @transform_0, window_bounds = array<i64: 1, 9, 9, 4>}, {transform_indices = @transform_1, window_bounds = array<i64: 1, 9, 9, 4>}, {transform_indices = @transform_2, window_bounds = array<i64: 1, 9, 9, 4>}, {transform_indices = @transform_3, window_bounds = array<i64: 1, 9, 9, 4>}, {pipeline_mode = #tpu.pipeline_mode<synchronous>, transform_indices = @transform_4, window_bounds = array<i64: 4, 4, 4, 128>}, {transform_indices = @transform_5, window_bounds = array<i64: 8, 128>}, {transform_indices = @transform_6, window_bounds = array<i64: 1, 2, 128>}]} {
    %cst = arith.constant 0.000000e+00 : f32
    %0 = vector.broadcast %cst : f32 to vector<8x128xf32>
    %c0_i32 = arith.constant 0 : i32
    %1 = arith.addi %arg1, %c0_i32 : i32
    %c0 = arith.constant 0 : index
    %2 = arith.index_cast %1 : i32 to index
    %c0_0 = arith.constant 0 : index
    %c0_1 = arith.constant 0 : index
    %3 = vector.load %arg2[%c0, %2, %c0_0, %c0_1] : memref<1x9x9x4xbf16, #tpu.memory_space<vmem>>, vector<1x1x9x4xbf16>
    %4 = vector.shape_cast %3 : vector<1x1x9x4xbf16> to vector<9x4xbf16>
    %c0_i32_2 = arith.constant 0 : i32
    %5 = arith.addi %arg1, %c0_i32_2 : i32
    %c0_3 = arith.constant 0 : index
    %6 = arith.index_cast %5 : i32 to index
    %c0_4 = arith.constant 0 : index
    %c0_5 = arith.constant 0 : index
    %7 = vector.load %arg3[%c0_3, %6, %c0_4, %c0_5] : memref<1x9x9x4xbf16, #tpu.memory_space<vmem>>, vector<1x1x9x4xbf16>
    %8 = vector.shape_cast %7 : vector<1x1x9x4xbf16> to vector<9x4xbf16>
    %9 = vector.extract_strided_slice %4 {offsets = [0, 0], sizes = [8, 4], strides = [1, 1]} : vector<9x4xbf16> to vector<8x4xbf16>
    %c0_6 = arith.constant 0 : index
    %c0_7 = arith.constant 0 : index
    %c0_8 = arith.constant 0 : index
    %c0_9 = arith.constant 0 : index
    %10 = vector.load %arg6[%c0_6, %c0_7, %c0_8, %c0_9] : memref<4x4x4x128xbf16, #tpu.memory_space<vmem>>, vector<1x1x4x128xbf16>
    %11 = vector.shape_cast %10 : vector<1x1x4x128xbf16> to vector<4x128xbf16>
    %cst_10 = arith.constant dense<0.000000e+00> : vector<8x128xf32>
    %12 = tpu.matmul %9, %11, %cst_10 {dimension_numbers = #tpu.dot_dimension_numbers<[1], [0], [0], [1], [0, 0, 1, 1], [], []>} : vector<8x4xbf16>, vector<4x128xbf16>, vector<8x128xf32> -> vector<8x128xf32>
    %13 = arith.addf %0, %12 : vector<8x128xf32>
    %14 = vector.extract_strided_slice %8 {offsets = [0, 0], sizes = [8, 4], strides = [1, 1]} : vector<9x4xbf16> to vector<8x4xbf16>
    %c0_11 = arith.constant 0 : index
    %c1 = arith.constant 1 : index
    %c0_12 = arith.constant 0 : index
    %c0_13 = arith.constant 0 : index
    %15 = vector.load %arg6[%c0_11, %c1, %c0_12, %c0_13] : memref<4x4x4x128xbf16, #tpu.memory_space<vmem>>, vector<1x1x4x128xbf16>
    %16 = vector.shape_cast %15 : vector<1x1x4x128xbf16> to vector<4x128xbf16>
    %cst_14 = arith.constant dense<0.000000e+00> : vector<8x128xf32>
    %17 = tpu.matmul %14, %16, %cst_14 {dimension_numbers = #tpu.dot_dimension_numbers<[1], [0], [0], [1], [0, 0, 1, 1], [], []>} : vector<8x4xbf16>, vector<4x128xbf16>, vector<8x128xf32> -> vector<8x128xf32>
    %18 = arith.addf %13, %17 : vector<8x128xf32>
    %19 = vector.extract_strided_slice %4 {offsets = [1, 0], sizes = [8, 4], strides = [1, 1]} : vector<9x4xbf16> to vector<8x4xbf16>
    %c0_15 = arith.constant 0 : index
    %c2 = arith.constant 2 : index
    %c0_16 = arith.constant 0 : index
    %c0_17 = arith.constant 0 : index
    %20 = vector.load %arg6[%c0_15, %c2, %c0_16, %c0_17] : memref<4x4x4x128xbf16, #tpu.memory_space<vmem>>, vector<1x1x4x128xbf16>
    %21 = vector.shape_cast %20 : vector<1x1x4x128xbf16> to vector<4x128xbf16>
    %cst_18 = arith.constant dense<0.000000e+00> : vector<8x128xf32>
    %22 = tpu.matmul %19, %21, %cst_18 {dimension_numbers = #tpu.dot_dimension_numbers<[1], [0], [0], [1], [0, 0, 1, 1], [], []>} : vector<8x4xbf16>, vector<4x128xbf16>, vector<8x128xf32> -> vector<8x128xf32>
    %23 = arith.addf %18, %22 : vector<8x128xf32>
    %24 = vector.extract_strided_slice %8 {offsets = [1, 0], sizes = [8, 4], strides = [1, 1]} : vector<9x4xbf16> to vector<8x4xbf16>
    %c0_19 = arith.constant 0 : index
    %c3 = arith.constant 3 : index
    %c0_20 = arith.constant 0 : index
    %c0_21 = arith.constant 0 : index
    %25 = vector.load %arg6[%c0_19, %c3, %c0_20, %c0_21] : memref<4x4x4x128xbf16, #tpu.memory_space<vmem>>, vector<1x1x4x128xbf16>
    %26 = vector.shape_cast %25 : vector<1x1x4x128xbf16> to vector<4x128xbf16>
    %cst_22 = arith.constant dense<0.000000e+00> : vector<8x128xf32>
    %27 = tpu.matmul %24, %26, %cst_22 {dimension_numbers = #tpu.dot_dimension_numbers<[1], [0], [0], [1], [0, 0, 1, 1], [], []>} : vector<8x4xbf16>, vector<4x128xbf16>, vector<8x128xf32> -> vector<8x128xf32>
    %28 = arith.addf %23, %27 : vector<8x128xf32>
    %c0_i32_23 = arith.constant 0 : i32
    %29 = arith.addi %arg1, %c0_i32_23 : i32
    %c0_24 = arith.constant 0 : index
    %30 = arith.index_cast %29 : i32 to index
    %c0_25 = arith.constant 0 : index
    %c0_26 = arith.constant 0 : index
    %31 = vector.load %arg4[%c0_24, %30, %c0_25, %c0_26] : memref<1x9x9x4xbf16, #tpu.memory_space<vmem>>, vector<1x1x9x4xbf16>
    %32 = vector.shape_cast %31 : vector<1x1x9x4xbf16> to vector<9x4xbf16>
    %c0_i32_27 = arith.constant 0 : i32
    %33 = arith.addi %arg1, %c0_i32_27 : i32
    %c0_28 = arith.constant 0 : index
    %34 = arith.index_cast %33 : i32 to index
    %c0_29 = arith.constant 0 : index
    %c0_30 = arith.constant 0 : index
    %35 = vector.load %arg5[%c0_28, %34, %c0_29, %c0_30] : memref<1x9x9x4xbf16, #tpu.memory_space<vmem>>, vector<1x1x9x4xbf16>
    %36 = vector.shape_cast %35 : vector<1x1x9x4xbf16> to vector<9x4xbf16>
    %37 = vector.extract_strided_slice %32 {offsets = [0, 0], sizes = [8, 4], strides = [1, 1]} : vector<9x4xbf16> to vector<8x4xbf16>
    %c1_31 = arith.constant 1 : index
    %c0_32 = arith.constant 0 : index
    %c0_33 = arith.constant 0 : index
    %c0_34 = arith.constant 0 : index
    %38 = vector.load %arg6[%c1_31, %c0_32, %c0_33, %c0_34] : memref<4x4x4x128xbf16, #tpu.memory_space<vmem>>, vector<1x1x4x128xbf16>
    %39 = vector.shape_cast %38 : vector<1x1x4x128xbf16> to vector<4x128xbf16>
    %cst_35 = arith.constant dense<0.000000e+00> : vector<8x128xf32>
    %40 = tpu.matmul %37, %39, %cst_35 {dimension_numbers = #tpu.dot_dimension_numbers<[1], [0], [0], [1], [0, 0, 1, 1], [], []>} : vector<8x4xbf16>, vector<4x128xbf16>, vector<8x128xf32> -> vector<8x128xf32>
    %41 = arith.addf %28, %40 : vector<8x128xf32>
    %42 = vector.extract_strided_slice %36 {offsets = [0, 0], sizes = [8, 4], strides = [1, 1]} : vector<9x4xbf16> to vector<8x4xbf16>
    %c1_36 = arith.constant 1 : index
    %c1_37 = arith.constant 1 : index
    %c0_38 = arith.constant 0 : index
    %c0_39 = arith.constant 0 : index
    %43 = vector.load %arg6[%c1_36, %c1_37, %c0_38, %c0_39] : memref<4x4x4x128xbf16, #tpu.memory_space<vmem>>, vector<1x1x4x128xbf16>
    %44 = vector.shape_cast %43 : vector<1x1x4x128xbf16> to vector<4x128xbf16>
    %cst_40 = arith.constant dense<0.000000e+00> : vector<8x128xf32>
    %45 = tpu.matmul %42, %44, %cst_40 {dimension_numbers = #tpu.dot_dimension_numbers<[1], [0], [0], [1], [0, 0, 1, 1], [], []>} : vector<8x4xbf16>, vector<4x128xbf16>, vector<8x128xf32> -> vector<8x128xf32>
    %46 = arith.addf %41, %45 : vector<8x128xf32>
    %47 = vector.extract_strided_slice %32 {offsets = [1, 0], sizes = [8, 4], strides = [1, 1]} : vector<9x4xbf16> to vector<8x4xbf16>
    %c1_41 = arith.constant 1 : index
    %c2_42 = arith.constant 2 : index
    %c0_43 = arith.constant 0 : index
    %c0_44 = arith.constant 0 : index
    %48 = vector.load %arg6[%c1_41, %c2_42, %c0_43, %c0_44] : memref<4x4x4x128xbf16, #tpu.memory_space<vmem>>, vector<1x1x4x128xbf16>
    %49 = vector.shape_cast %48 : vector<1x1x4x128xbf16> to vector<4x128xbf16>
    %cst_45 = arith.constant dense<0.000000e+00> : vector<8x128xf32>
    %50 = tpu.matmul %47, %49, %cst_45 {dimension_numbers = #tpu.dot_dimension_numbers<[1], [0], [0], [1], [0, 0, 1, 1], [], []>} : vector<8x4xbf16>, vector<4x128xbf16>, vector<8x128xf32> -> vector<8x128xf32>
    %51 = arith.addf %46, %50 : vector<8x128xf32>
    %52 = vector.extract_strided_slice %36 {offsets = [1, 0], sizes = [8, 4], strides = [1, 1]} : vector<9x4xbf16> to vector<8x4xbf16>
    %c1_46 = arith.constant 1 : index
    %c3_47 = arith.constant 3 : index
    %c0_48 = arith.constant 0 : index
    %c0_49 = arith.constant 0 : index
    %53 = vector.load %arg6[%c1_46, %c3_47, %c0_48, %c0_49] : memref<4x4x4x128xbf16, #tpu.memory_space<vmem>>, vector<1x1x4x128xbf16>
    %54 = vector.shape_cast %53 : vector<1x1x4x128xbf16> to vector<4x128xbf16>
    %cst_50 = arith.constant dense<0.000000e+00> : vector<8x128xf32>
    %55 = tpu.matmul %52, %54, %cst_50 {dimension_numbers = #tpu.dot_dimension_numbers<[1], [0], [0], [1], [0, 0, 1, 1], [], []>} : vector<8x4xbf16>, vector<4x128xbf16>, vector<8x128xf32> -> vector<8x128xf32>
    %56 = arith.addf %51, %55 : vector<8x128xf32>
    %c1_i32 = arith.constant 1 : i32
    %57 = arith.addi %arg1, %c1_i32 : i32
    %c0_51 = arith.constant 0 : index
    %58 = arith.index_cast %57 : i32 to index
    %c0_52 = arith.constant 0 : index
    %c0_53 = arith.constant 0 : index
    %59 = vector.load %arg2[%c0_51, %58, %c0_52, %c0_53] : memref<1x9x9x4xbf16, #tpu.memory_space<vmem>>, vector<1x1x9x4xbf16>
    %60 = vector.shape_cast %59 : vector<1x1x9x4xbf16> to vector<9x4xbf16>
    %c1_i32_54 = arith.constant 1 : i32
    %61 = arith.addi %arg1, %c1_i32_54 : i32
    %c0_55 = arith.constant 0 : index
    %62 = arith.index_cast %61 : i32 to index
    %c0_56 = arith.constant 0 : index
    %c0_57 = arith.constant 0 : index
    %63 = vector.load %arg3[%c0_55, %62, %c0_56, %c0_57] : memref<1x9x9x4xbf16, #tpu.memory_space<vmem>>, vector<1x1x9x4xbf16>
    %64 = vector.shape_cast %63 : vector<1x1x9x4xbf16> to vector<9x4xbf16>
    %65 = vector.extract_strided_slice %60 {offsets = [0, 0], sizes = [8, 4], strides = [1, 1]} : vector<9x4xbf16> to vector<8x4xbf16>
    %c2_58 = arith.constant 2 : index
    %c0_59 = arith.constant 0 : index
    %c0_60 = arith.constant 0 : index
    %c0_61 = arith.constant 0 : index
    %66 = vector.load %arg6[%c2_58, %c0_59, %c0_60, %c0_61] : memref<4x4x4x128xbf16, #tpu.memory_space<vmem>>, vector<1x1x4x128xbf16>
    %67 = vector.shape_cast %66 : vector<1x1x4x128xbf16> to vector<4x128xbf16>
    %cst_62 = arith.constant dense<0.000000e+00> : vector<8x128xf32>
    %68 = tpu.matmul %65, %67, %cst_62 {dimension_numbers = #tpu.dot_dimension_numbers<[1], [0], [0], [1], [0, 0, 1, 1], [], []>} : vector<8x4xbf16>, vector<4x128xbf16>, vector<8x128xf32> -> vector<8x128xf32>
    %69 = arith.addf %56, %68 : vector<8x128xf32>
    %70 = vector.extract_strided_slice %64 {offsets = [0, 0], sizes = [8, 4], strides = [1, 1]} : vector<9x4xbf16> to vector<8x4xbf16>
    %c2_63 = arith.constant 2 : index
    %c1_64 = arith.constant 1 : index
    %c0_65 = arith.constant 0 : index
    %c0_66 = arith.constant 0 : index
    %71 = vector.load %arg6[%c2_63, %c1_64, %c0_65, %c0_66] : memref<4x4x4x128xbf16, #tpu.memory_space<vmem>>, vector<1x1x4x128xbf16>
    %72 = vector.shape_cast %71 : vector<1x1x4x128xbf16> to vector<4x128xbf16>
    %cst_67 = arith.constant dense<0.000000e+00> : vector<8x128xf32>
    %73 = tpu.matmul %70, %72, %cst_67 {dimension_numbers = #tpu.dot_dimension_numbers<[1], [0], [0], [1], [0, 0, 1, 1], [], []>} : vector<8x4xbf16>, vector<4x128xbf16>, vector<8x128xf32> -> vector<8x128xf32>
    %74 = arith.addf %69, %73 : vector<8x128xf32>
    %75 = vector.extract_strided_slice %60 {offsets = [1, 0], sizes = [8, 4], strides = [1, 1]} : vector<9x4xbf16> to vector<8x4xbf16>
    %c2_68 = arith.constant 2 : index
    %c2_69 = arith.constant 2 : index
    %c0_70 = arith.constant 0 : index
    %c0_71 = arith.constant 0 : index
    %76 = vector.load %arg6[%c2_68, %c2_69, %c0_70, %c0_71] : memref<4x4x4x128xbf16, #tpu.memory_space<vmem>>, vector<1x1x4x128xbf16>
    %77 = vector.shape_cast %76 : vector<1x1x4x128xbf16> to vector<4x128xbf16>
    %cst_72 = arith.constant dense<0.000000e+00> : vector<8x128xf32>
    %78 = tpu.matmul %75, %77, %cst_72 {dimension_numbers = #tpu.dot_dimension_numbers<[1], [0], [0], [1], [0, 0, 1, 1], [], []>} : vector<8x4xbf16>, vector<4x128xbf16>, vector<8x128xf32> -> vector<8x128xf32>
    %79 = arith.addf %74, %78 : vector<8x128xf32>
    %80 = vector.extract_strided_slice %64 {offsets = [1, 0], sizes = [8, 4], strides = [1, 1]} : vector<9x4xbf16> to vector<8x4xbf16>
    %c2_73 = arith.constant 2 : index
    %c3_74 = arith.constant 3 : index
    %c0_75 = arith.constant 0 : index
    %c0_76 = arith.constant 0 : index
    %81 = vector.load %arg6[%c2_73, %c3_74, %c0_75, %c0_76] : memref<4x4x4x128xbf16, #tpu.memory_space<vmem>>, vector<1x1x4x128xbf16>
    %82 = vector.shape_cast %81 : vector<1x1x4x128xbf16> to vector<4x128xbf16>
    %cst_77 = arith.constant dense<0.000000e+00> : vector<8x128xf32>
    %83 = tpu.matmul %80, %82, %cst_77 {dimension_numbers = #tpu.dot_dimension_numbers<[1], [0], [0], [1], [0, 0, 1, 1], [], []>} : vector<8x4xbf16>, vector<4x128xbf16>, vector<8x128xf32> -> vector<8x128xf32>
    %84 = arith.addf %79, %83 : vector<8x128xf32>
    %c1_i32_78 = arith.constant 1 : i32
    %85 = arith.addi %arg1, %c1_i32_78 : i32
    %c0_79 = arith.constant 0 : index
    %86 = arith.index_cast %85 : i32 to index
    %c0_80 = arith.constant 0 : index
    %c0_81 = arith.constant 0 : index
    %87 = vector.load %arg4[%c0_79, %86, %c0_80, %c0_81] : memref<1x9x9x4xbf16, #tpu.memory_space<vmem>>, vector<1x1x9x4xbf16>
    %88 = vector.shape_cast %87 : vector<1x1x9x4xbf16> to vector<9x4xbf16>
    %c1_i32_82 = arith.constant 1 : i32
    %89 = arith.addi %arg1, %c1_i32_82 : i32
    %c0_83 = arith.constant 0 : index
    %90 = arith.index_cast %89 : i32 to index
    %c0_84 = arith.constant 0 : index
    %c0_85 = arith.constant 0 : index
    %91 = vector.load %arg5[%c0_83, %90, %c0_84, %c0_85] : memref<1x9x9x4xbf16, #tpu.memory_space<vmem>>, vector<1x1x9x4xbf16>
    %92 = vector.shape_cast %91 : vector<1x1x9x4xbf16> to vector<9x4xbf16>
    %93 = vector.extract_strided_slice %88 {offsets = [0, 0], sizes = [8, 4], strides = [1, 1]} : vector<9x4xbf16> to vector<8x4xbf16>
    %c3_86 = arith.constant 3 : index
    %c0_87 = arith.constant 0 : index
    %c0_88 = arith.constant 0 : index
    %c0_89 = arith.constant 0 : index
    %94 = vector.load %arg6[%c3_86, %c0_87, %c0_88, %c0_89] : memref<4x4x4x128xbf16, #tpu.memory_space<vmem>>, vector<1x1x4x128xbf16>
    %95 = vector.shape_cast %94 : vector<1x1x4x128xbf16> to vector<4x128xbf16>
    %cst_90 = arith.constant dense<0.000000e+00> : vector<8x128xf32>
    %96 = tpu.matmul %93, %95, %cst_90 {dimension_numbers = #tpu.dot_dimension_numbers<[1], [0], [0], [1], [0, 0, 1, 1], [], []>} : vector<8x4xbf16>, vector<4x128xbf16>, vector<8x128xf32> -> vector<8x128xf32>
    %97 = arith.addf %84, %96 : vector<8x128xf32>
    %98 = vector.extract_strided_slice %92 {offsets = [0, 0], sizes = [8, 4], strides = [1, 1]} : vector<9x4xbf16> to vector<8x4xbf16>
    %c3_91 = arith.constant 3 : index
    %c1_92 = arith.constant 1 : index
    %c0_93 = arith.constant 0 : index
    %c0_94 = arith.constant 0 : index
    %99 = vector.load %arg6[%c3_91, %c1_92, %c0_93, %c0_94] : memref<4x4x4x128xbf16, #tpu.memory_space<vmem>>, vector<1x1x4x128xbf16>
    %100 = vector.shape_cast %99 : vector<1x1x4x128xbf16> to vector<4x128xbf16>
    %cst_95 = arith.constant dense<0.000000e+00> : vector<8x128xf32>
    %101 = tpu.matmul %98, %100, %cst_95 {dimension_numbers = #tpu.dot_dimension_numbers<[1], [0], [0], [1], [0, 0, 1, 1], [], []>} : vector<8x4xbf16>, vector<4x128xbf16>, vector<8x128xf32> -> vector<8x128xf32>
    %102 = arith.addf %97, %101 : vector<8x128xf32>
    %103 = vector.extract_strided_slice %88 {offsets = [1, 0], sizes = [8, 4], strides = [1, 1]} : vector<9x4xbf16> to vector<8x4xbf16>
    %c3_96 = arith.constant 3 : index
    %c2_97 = arith.constant 2 : index
    %c0_98 = arith.constant 0 : index
    %c0_99 = arith.constant 0 : index
    %104 = vector.load %arg6[%c3_96, %c2_97, %c0_98, %c0_99] : memref<4x4x4x128xbf16, #tpu.memory_space<vmem>>, vector<1x1x4x128xbf16>
    %105 = vector.shape_cast %104 : vector<1x1x4x128xbf16> to vector<4x128xbf16>
    %cst_100 = arith.constant dense<0.000000e+00> : vector<8x128xf32>
    %106 = tpu.matmul %103, %105, %cst_100 {dimension_numbers = #tpu.dot_dimension_numbers<[1], [0], [0], [1], [0, 0, 1, 1], [], []>} : vector<8x4xbf16>, vector<4x128xbf16>, vector<8x128xf32> -> vector<8x128xf32>
    %107 = arith.addf %102, %106 : vector<8x128xf32>
    %108 = vector.extract_strided_slice %92 {offsets = [1, 0], sizes = [8, 4], strides = [1, 1]} : vector<9x4xbf16> to vector<8x4xbf16>
    %c3_101 = arith.constant 3 : index
    %c3_102 = arith.constant 3 : index
    %c0_103 = arith.constant 0 : index
    %c0_104 = arith.constant 0 : index
    %109 = vector.load %arg6[%c3_101, %c3_102, %c0_103, %c0_104] : memref<4x4x4x128xbf16, #tpu.memory_space<vmem>>, vector<1x1x4x128xbf16>
    %110 = vector.shape_cast %109 : vector<1x1x4x128xbf16> to vector<4x128xbf16>
    %cst_105 = arith.constant dense<0.000000e+00> : vector<8x128xf32>
    %111 = tpu.matmul %108, %110, %cst_105 {dimension_numbers = #tpu.dot_dimension_numbers<[1], [0], [0], [1], [0, 0, 1, 1], [], []>} : vector<8x4xbf16>, vector<4x128xbf16>, vector<8x128xf32> -> vector<8x128xf32>
    %112 = arith.addf %107, %111 : vector<8x128xf32>
    %113 = arith.truncf %112 : vector<8x128xf32> to vector<8x128xbf16>
    %c0_106 = arith.constant 0 : index
    %c0_107 = arith.constant 0 : index
    %114 = vector.load %arg7[%c0_106, %c0_107] : memref<8x128xbf16, #tpu.memory_space<vmem>>, vector<8x128xbf16>
    tpu.vector_store %arg7[%c0_106, %c0_107], %113 {strides = array<i32>} : memref<8x128xbf16, #tpu.memory_space<vmem>>, vector<8x128xbf16>,
    %cst_108 = arith.constant dense<0.000000e+00> : vector<128xf32>
    %115 = vector.multi_reduction <add>, %112, %cst_108 [0] : vector<8x128xf32> to vector<128xf32>
    %116 = vector.shape_cast %115 : vector<128xf32> to vector<1x128xf32>
    %c0_109 = arith.constant 0 : index
    %c0_110 = arith.constant 0 : index
    %c0_111 = arith.constant 0 : index
    %117 = vector.load %arg8[%c0_109, %c0_110, %c0_111] : memref<1x2x128xf32, #tpu.memory_space<vmem>>, vector<1x1x128xf32>
    %118 = vector.shape_cast %117 : vector<1x1x128xf32> to vector<1x128xf32>
    %119 = vector.shape_cast %116 : vector<1x128xf32> to vector<1x1x128xf32>
    tpu.vector_store %arg8[%c0_109, %c0_110, %c0_111], %119 {strides = array<i32>} : memref<1x2x128xf32, #tpu.memory_space<vmem>>, vector<1x1x128xf32>,
    %120 = arith.mulf %112, %112 : vector<8x128xf32>
    %cst_112 = arith.constant dense<0.000000e+00> : vector<128xf32>
    %121 = vector.multi_reduction <add>, %120, %cst_112 [0] : vector<8x128xf32> to vector<128xf32>
    %122 = vector.shape_cast %121 : vector<128xf32> to vector<1x128xf32>
    %c0_113 = arith.constant 0 : index
    %c1_114 = arith.constant 1 : index
    %c0_115 = arith.constant 0 : index
    %123 = vector.load %arg8[%c0_113, %c1_114, %c0_115] : memref<1x2x128xf32, #tpu.memory_space<vmem>>, vector<1x1x128xf32>
    %124 = vector.shape_cast %123 : vector<1x1x128xf32> to vector<1x128xf32>
    %125 = vector.shape_cast %122 : vector<1x128xf32> to vector<1x1x128xf32>
    tpu.vector_store %arg8[%c0_113, %c1_114, %c0_115], %125 {strides = array<i32>} : memref<1x2x128xf32, #tpu.memory_space<vmem>>, vector<1x1x128xf32>,
    return
  }
  func.func @transform_0(%arg0: i32, %arg1: i32) -> (i32, i32, i32, i32) {
    %c0_i32 = arith.constant 0 : i32
    %c0_i32_0 = arith.constant 0 : i32
    %c0_i32_1 = arith.constant 0 : i32
    %c0_i32_2 = arith.constant 0 : i32
    return %arg0, %c0_i32, %c0_i32_0, %c0_i32_1 : i32, i32, i32, i32
  }
  func.func @transform_1(%arg0: i32, %arg1: i32) -> (i32, i32, i32, i32) {
    %c0_i32 = arith.constant 0 : i32
    %c0_i32_0 = arith.constant 0 : i32
    %c0_i32_1 = arith.constant 0 : i32
    %c0_i32_2 = arith.constant 0 : i32
    return %arg0, %c0_i32, %c0_i32_0, %c0_i32_1 : i32, i32, i32, i32
  }
  func.func @transform_2(%arg0: i32, %arg1: i32) -> (i32, i32, i32, i32) {
    %c0_i32 = arith.constant 0 : i32
    %c0_i32_0 = arith.constant 0 : i32
    %c0_i32_1 = arith.constant 0 : i32
    %c0_i32_2 = arith.constant 0 : i32
    return %arg0, %c0_i32, %c0_i32_0, %c0_i32_1 : i32, i32, i32, i32
  }
  func.func @transform_3(%arg0: i32, %arg1: i32) -> (i32, i32, i32, i32) {
    %c0_i32 = arith.constant 0 : i32
    %c0_i32_0 = arith.constant 0 : i32
    %c0_i32_1 = arith.constant 0 : i32
    %c0_i32_2 = arith.constant 0 : i32
    return %arg0, %c0_i32, %c0_i32_0, %c0_i32_1 : i32, i32, i32, i32
  }
  func.func @transform_4(%arg0: i32, %arg1: i32) -> (i32, i32, i32, i32) {
    %c0_i32 = arith.constant 0 : i32
    %c0_i32_0 = arith.constant 0 : i32
    %c0_i32_1 = arith.constant 0 : i32
    %c0_i32_2 = arith.constant 0 : i32
    %c0_i32_3 = arith.constant 0 : i32
    return %c0_i32, %c0_i32_0, %c0_i32_1, %c0_i32_2 : i32, i32, i32, i32
  }
  func.func @transform_5(%arg0: i32, %arg1: i32) -> (i32, i32) {
    %c8_i32 = arith.constant 8 : i32
    %0 = arith.muli %arg0, %c8_i32 : i32
    %1 = arith.addi %0, %arg1 : i32
    %c0_i32 = arith.constant 0 : i32
    %c0_i32_0 = arith.constant 0 : i32
    return %1, %c0_i32 : i32, i32
  }
  func.func @transform_6(%arg0: i32, %arg1: i32) -> (i32, i32, i32) {
    %c8_i32 = arith.constant 8 : i32
    %0 = arith.muli %arg0, %c8_i32 : i32
    %1 = arith.addi %0, %arg1 : i32
    %c0_i32 = arith.constant 0 : i32
    %c0_i32_0 = arith.constant 0 : i32
    %c0_i32_1 = arith.constant 0 : i32
    return %1, %c0_i32, %c0_i32_0 : i32, i32, i32
  }
}

module attributes {stable_mosaic.version = 11 : i64} {
  func.func @kernel(%arg0: i32, %arg1: memref<64x128xbf16, #tpu.memory_space<vmem>>, %arg2: memref<1x128xf32, #tpu.memory_space<vmem>>, %arg3: memref<1x128xf32, #tpu.memory_space<vmem>>, %arg4: memref<64x8xf32, #tpu.memory_space<vmem>>) attributes {dimension_semantics = [#tpu.dimension_semantics<parallel>], iteration_bounds = array<i64: 2>, scalar_prefetch = 0 : i64, scratch_operands = 0 : i64, tpu.core_type = #tpu.core_type<tc>, window_params = [{transform_indices = @transform_0, window_bounds = array<i64: 64, 128>}, {pipeline_mode = #tpu.pipeline_mode<synchronous>, transform_indices = @transform_1, window_bounds = array<i64: 1, 128>}, {pipeline_mode = #tpu.pipeline_mode<synchronous>, transform_indices = @transform_2, window_bounds = array<i64: 1, 128>}, {transform_indices = @transform_3, window_bounds = array<i64: 64, 8>}]} {
    %c0 = arith.constant 0 : index
    %c0_0 = arith.constant 0 : index
    %0 = vector.load %arg1[%c0, %c0_0] : memref<64x128xbf16, #tpu.memory_space<vmem>>, vector<64x128xbf16>
    %1 = arith.extf %0 : vector<64x128xbf16> to vector<64x128xf32>
    %c0_1 = arith.constant 0 : index
    %c0_2 = arith.constant 0 : index
    %2 = vector.load %arg2[%c0_1, %c0_2] : memref<1x128xf32, #tpu.memory_space<vmem>>, vector<1x128xf32>
    %3 = vector.broadcast %2 : vector<1x128xf32> to vector<64x128xf32>
    %4 = arith.mulf %1, %3 : vector<64x128xf32>
    %c0_3 = arith.constant 0 : index
    %c0_4 = arith.constant 0 : index
    %5 = vector.load %arg3[%c0_3, %c0_4] : memref<1x128xf32, #tpu.memory_space<vmem>>, vector<1x128xf32>
    %6 = vector.broadcast %5 : vector<1x128xf32> to vector<64x128xf32>
    %7 = arith.addf %4, %6 : vector<64x128xf32>
    %cst = arith.constant 0.000000e+00 : f32
    %8 = vector.broadcast %cst : f32 to vector<64x128xf32>
    %9 = arith.cmpf ogt, %7, %8 : vector<64x128xf32>
    %cst_5 = arith.constant 2.000000e-01 : f32
    %10 = vector.broadcast %cst_5 : f32 to vector<64x128xf32>
    %11 = arith.mulf %10, %7 : vector<64x128xf32>
    %12 = arith.select %9, %7, %11 : vector<64x128xi1>, vector<64x128xf32>
    %13 = vector.extract_strided_slice %12 {offsets = [0, 0], sizes = [64, 8], strides = [1, 1]} : vector<64x128xf32> to vector<64x8xf32>
    %c0_6 = arith.constant 0 : index
    %c0_7 = arith.constant 0 : index
    %14 = vector.load %arg4[%c0_6, %c0_7] : memref<64x8xf32, #tpu.memory_space<vmem>>, vector<64x8xf32>
    tpu.vector_store %arg4[%c0_6, %c0_7], %13 {strides = array<i32>} : memref<64x8xf32, #tpu.memory_space<vmem>>, vector<64x8xf32>,
    return
  }
  func.func @transform_0(%arg0: i32) -> (i32, i32) {
    %c0_i32 = arith.constant 0 : i32
    %c0_i32_0 = arith.constant 0 : i32
    return %arg0, %c0_i32 : i32, i32
  }
  func.func @transform_1(%arg0: i32) -> (i32, i32) {
    %c0_i32 = arith.constant 0 : i32
    %c0_i32_0 = arith.constant 0 : i32
    %c0_i32_1 = arith.constant 0 : i32
    return %c0_i32, %c0_i32_0 : i32, i32
  }
  func.func @transform_2(%arg0: i32) -> (i32, i32) {
    %c0_i32 = arith.constant 0 : i32
    %c0_i32_0 = arith.constant 0 : i32
    %c0_i32_1 = arith.constant 0 : i32
    return %c0_i32, %c0_i32_0 : i32, i32
  }
  func.func @transform_3(%arg0: i32) -> (i32, i32) {
    %c0_i32 = arith.constant 0 : i32
    %c0_i32_0 = arith.constant 0 : i32
    return %arg0, %c0_i32 : i32, i32
  }
}

</mosaic_0001>

<bundles_post_ra>
// kernel: unet_down.3
= control target key start
LH: loop header
LB: loop body
LE: loop exit
PB: predicated region body
PF: predicated region fallthrough
CT: control target
= control target key end

     0   :  { %s377_s12 = smov 0   ;;  %s422_s0 = inlined_call_operand.vmem [shape: bf16[128,128], index: 0, kind: input, shape index: {}]   ;;  %s423_s1 = inlined_call_operand.vmem [shape: f32[1,128], index: 1, kind: input, shape index: {}]   ;;  %s424_s2 = inlined_call_operand.vmem [shape: f32[1,128], index: 2, kind: input, shape index: {}]   ;;  %s425_s3 = inlined_call_operand.vmem [shape: f32[128,8], index: 3, kind: output, shape index: {}]  }
   0x1 LB: > { %s309_s13 = sadd.s32 4294967295, %s355_s12   ;;  %p313_p0 = scmp.ge.s32.totalorder %s355_s12, 1  ;;  %s355_s12 = sphi %s377_s12, %s13_s12  }
   0x2   : > { %p138_p1 = scmp.lt.s32.totalorder %s355_s12, 3 }
   0x4   : > { %p139_p2 = pnand %p313_p0, %p138_p1 }
   0x5   : > { %s314_s14 = sshll.u32 (!%p139_p2), %s309_s13, 3 }
   0x6   : > { %142 = sbr.rel (%p139_p2) target bundleno = 30 (0x1e), region = 32  ;;  %p163_p3 = scmp.lt.s32.totalorder (!%p139_p2), %s314_s14, 15 }
   0xb   : > { %s427_s14 = smov (!%p163_p3, %s314_s14), 15  ;;  %v318_v0 = vld [vmem:[%s423_s1] ss:$0 sm:$0xff]  ;;  %vm244_vm0 = vcmask 64512  }
   0xc   : > { %s315_s15 = sshll.u32 %s427_s14, 2  ;;  %v319_v9 = vld [vmem:[%s424_s2] ss:$0 sm:$0xff]  ;;  %s317_s23 = sshll.u32 %s427_s14, 3 }
   0xd   : > { %s166_s18 = scalar_lea.vmem %s422_s0, %s315_s15  ;;  %s401_s26 = scalar_lea.vmem %s425_s3, %s317_s23 }
   0xe   : > { %v323_v1 = vld [vmem:[%s166_s18] sm:$0xff]   ;;  %v338_v2 = vld [vmem:[%s166_s18 + $0x8] sm:$0xff]   ;;  %v339_v3 = vld [vmem:[%s166_s18 + $0x10] sm:$0xff]  }
   0xf   : > { %v324_v4 = vunpack.c.l.bf16 %v323_v1  ;;  %v325_v5 = vunpack.c.h.bf16 %v323_v1  ;;  %v328_v6 = vunpack.c.l.bf16 %v338_v2  ;;  %v329_v7 = vunpack.c.h.bf16 %v338_v2  ;;  %v340_v8 = vld [vmem:[%s166_s18 + $0x18] sm:$0xff]  }
  0x10   : > { %v332_v10 = vunpack.c.l.bf16 %v339_v3  ;;  %v333_v11 = vunpack.c.h.bf16 %v339_v3  ;;  %v336_v12 = vunpack.c.l.bf16 %v340_v8  ;;  %v337_v13 = vunpack.c.h.bf16 %v340_v8 }
  0x11   : > { %v197_v14 = vmul.f32 %v324_v4, %v318_v0  ;;  %v198_v15 = vmul.f32 %v325_v5, %v318_v0  ;;  %v199_v16 = vmul.f32 %v328_v6, %v318_v0  ;;  %v200_v17 = vmul.f32 %v329_v7, %v318_v0 }
  0x12   : > { %v201_v18 = vmul.f32 %v332_v10, %v318_v0  ;;  %v202_v19 = vmul.f32 %v333_v11, %v318_v0  ;;  %v203_v20 = vmul.f32 %v336_v12, %v318_v0  ;;  %v204_v21 = vmul.f32 %v337_v13, %v318_v0 }
  0x13   : > { %v212_v22 = vadd.f32 %v319_v9, %v197_v14  ;;  %v213_v23 = vadd.f32 %v319_v9, %v198_v15  ;;  %v214_v24 = vadd.f32 %v319_v9, %v199_v16  ;;  %v215_v25 = vadd.f32 %v319_v9, %v200_v17 }
  0x14   : > { %v216_v26 = vadd.f32 %v319_v9, %v201_v18  ;;  %v217_v27 = vadd.f32 %v319_v9, %v202_v19  ;;  %v218_v28 = vadd.f32 %v319_v9, %v203_v20  ;;  %v219_v29 = vadd.f32 %v319_v9, %v204_v21 }
  0x15   : > { %vm220_vm1 = vcmp.gt.f32.partialorder %v212_v22, 0.0  ;;  %v228_v30 = vmul.f32 0.2, %v212_v22  ;;  %vm221_vm2 = vcmp.gt.f32.partialorder %v213_v23, 0.0  ;;  %v229_v31 = vmul.f32 0.2, %v213_v23 }
  0x16   : > { %vm222_vm3 = vcmp.gt.f32.partialorder %v214_v24, 0.0  ;;  %v230_v32 = vmul.f32 0.2, %v214_v24  ;;  %vm223_vm4 = vcmp.gt.f32.partialorder %v215_v25, 0.0  ;;  %v231_v33 = vmul.f32 0.2, %v215_v25 }
  0x17   : > { %v236_v34 = vsel %vm220_vm1, %v212_v22, %v228_v30  ;;  %v237_v35 = vsel %vm221_vm2, %v213_v23, %v229_v31  ;;  %vm224_vm5 = vcmp.gt.f32.partialorder %v216_v26, 0.0  ;;  %v232_v36 = vmul.f32 0.2, %v216_v26 }
  0x18   : > { %245 = vst.msk [vmem:[%s401_s26] sm:$0xff] %vm244_vm0, %v236_v34  ;;  %246 = vst.msk [vmem:[%s401_s26 + $0x8] sm:$0xff] %vm244_vm0, %v237_v35  ;;  %v238_v37 = vsel %vm222_vm3, %v214_v24, %v230_v32  ;;  %v239_v38 = vsel %vm223_vm4, %v215_v25, %v231_v33  ;;  %vm225_vm6 = vcmp.gt.f32.partialorder %v217_v27, 0.0  ;;  %v233_v39 = vmul.f32 0.2, %v217_v27 }
  0x19   : > { %247 = vst.msk [vmem:[%s401_s26 + $0x10] sm:$0xff] %vm244_vm0, %v238_v37  ;;  %248 = vst.msk [vmem:[%s401_s26 + $0x18] sm:$0xff] %vm244_vm0, %v239_v38  ;;  %v240_v40 = vsel %vm224_vm5, %v216_v26, %v232_v36  ;;  %vm226_vm7 = vcmp.gt.f32.partialorder %v218_v28, 0.0  ;;  %v234_v41 = vmul.f32 0.2, %v218_v28  ;;  %vm227_vm8 = vcmp.gt.f32.partialorder %v219_v29, 0.0 }
  0x1a   : > { %249 = vst.msk [vmem:[%s401_s26 + $0x20] sm:$0xff] %vm244_vm0, %v240_v40  ;;  %v241_v42 = vsel %vm225_vm6, %v217_v27, %v233_v39  ;;  %v235_v43 = vmul.f32 0.2, %v219_v29 }
  0x1b   : > { %250 = vst.msk [vmem:[%s401_s26 + $0x28] sm:$0xff] %vm244_vm0, %v241_v42  ;;  %v242_v44 = vsel %vm226_vm7, %v218_v28, %v234_v41 }
  0x1c   : > { %251 = vst.msk [vmem:[%s401_s26 + $0x30] sm:$0xff] %vm244_vm0, %v242_v44  ;;  %v243_v45 = vsel %vm227_vm8, %v219_v29, %v235_v43 }
  0x1d   : > { %252 = vst.msk [vmem:[%s401_s26 + $0x38] sm:$0xff] %vm244_vm0, %v243_v45 }
  0x1e PF: > { %s13_s12 = sadd.s32 1, %s355_s12  }
  0x1f   : > { %p10_p4 = scmp.ge.s32.totalorder %s13_s12, 4  }
  0x21   :  { %12 = sbr.rel (!%p10_p4) target bundleno = 1 (0x1), region = 62 }

// kernel: unet_down.2
= control target key start
LH: loop header
LB: loop body
LE: loop exit
PB: predicated region body
PF: predicated region fallthrough
CT: control target
= control target key end

     0   :  { %s1784_s21 = smov 0   ;;  %s1786_s22 = smov 0   ;;  %s2024_s0 = inlined_call_operand.vmem [shape: bf16[2,9,9,4], index: 0, kind: input, shape index: {}]   ;;  %s2025_s1 = inlined_call_operand.vmem [shape: bf16[2,9,9,4], index: 1, kind: input, shape index: {}]   ;;  %s2026_s2 = inlined_call_operand.vmem [shape: bf16[2,9,9,4], index: 2, kind: input, shape index: {}]   ;;  %s2027_s3 = inlined_call_operand.vmem [shape: bf16[2,9,9,4], index: 3, kind: input, shape index: {}]   ;;  %s2028_s4 = inlined_call_operand.vmem [shape: bf16[4,4,4,128], index: 4, kind: input, shape index: {}]   ;;  %s2029_s5 = inlined_call_operand.vmem [shape: bf16[128,128], index: 5, kind: output, shape index: {0}]   ;;  %s2030_s6 = inlined_call_operand.vmem [shape: f32[16,2,128], index: 6, kind: output, shape index: {1}]  }
   0x1   :  { %s1788_s23 = smov 0   ;;  %s1790_s24 = smov 0  }
   0x2   :  { %s1792_s25 = smov 0  }
   0x3 LB: > { %s26_s26 = sadd.s32 1, %s1737_s23  ;;  %s29_s27 = sadd.s32 1, %s1741_s24  ;;  %s1745_s25 = sphi %s1792_s25, %s17_s25   ;;  %s1741_s24 = sphi %s1790_s24, %s2034_s24   ;;  %s1737_s23 = sphi %s1788_s23, %s2033_s23   ;;  %s1733_s22 = sphi %s1786_s22, %s2032_s22   ;;  %s1729_s21 = sphi %s1784_s21, %s2031_s21  }
   0x4   : > { %p27_p0 = scmp.ge.s32.totalorder %s26_s26, 8  ;;  %p1457_p1 = scmp.ge.s32.totalorder %s1745_s25, 1 }
   0x5   : > { %p265_p2 = scmp.lt.s32.totalorder %s1745_s25, 17 }
   0x6   : > { %s2036_s26 = smov (%p27_p0, %s26_s26), 0  ;;  %s2038_s27 = smov (!%p27_p0, %s29_s27), %s1741_s24 }
   0x7   : > { %p266_p3 = pnand %p1457_p1, %p265_p2  ;;  %p31_p4 = scmp.ge.s32.totalorder %s2038_s27, 2 }
   0x8   : > { %p317_p5 = scmp.lt.s32.totalorder (!%p266_p3), %s1733_s22, 1  ;;  %s1839_s10 = sshll.u32 (!%p266_p3), %s1729_s21, 3 }
   0x9   : > { %s2040_s27 = smov (%p31_p4, %s2038_s27), 0  ;;  %269 = sbr.rel (%p266_p3) target bundleno = 291 (0x123), region = 40 }
   0xa   : > { %s1462_s30 = sshll.u32 (!%p266_p3), %s1733_s22, 3 }
   0xb   : > { %s338_s7 = sadd.s32 (!%p266_p3), %s1729_s21, %s1462_s30 }
   0xc   : > { %p339_p6 = scmp.lt.s32.totalorder (!%p266_p3), %s338_s7, 15 }
   0xe   : > { %v1469_v0 = vld [vmem:[%s2028_s4 + $0x2] sm:$0x3]  ;;  %vm370_vm0 = vcmask 1041408   ;;  %v363_v1 = vld [vmem:[%s2028_s4] sm:$0x3]  ;;  %v1747_v2 = vmov 0.0  }
   0xf   : > { %1560 = vmatprep.subr.bf16.mxu0 %v1747_v2  ;;  %v372_v3 = vsel %vm370_vm0, %v1469_v0, 0  ;;  %1566 = vmatprep.subr.bf16.mxu1 %v1747_v2  ;;  %v418_v4 = vsel %vm370_vm0, %v363_v1, 0  ;;  %vm1748_vm1 = vmmov 0   ;;  %s318_s8 = scalar_select %p317_p5, %s1733_s22, 1  ;;  %v1472_v5 = vld [vmem:[%s2028_s4 + $0x4] sm:$0x3] }
  0x10   : > { %1561 = vmatpush3.bf16.msra.mxu0 %v372_v3  ;;  %1567 = vmatpush3.bf16.msra.mxu1 %v418_v4  ;;  %v1475_v6 = vld [vmem:[%s2028_s4 + $0x6] sm:$0x3]  ;;  %vm366_vm2 = vcmask 31744   ;;  %v478_v7 = vsel %vm370_vm0, %v1472_v5, 0  ;;  %v1482_v19 = vld [vmem:[%s2028_s4 + $0xa] sm:$0x3] }
  0x11   : > { %1562 = vmatprep.mubr.msk.bf16.mxu0 %vm1748_vm1, %v1747_v2  ;;  %1568 = vmatprep.mubr.msk.bf16.mxu1 %vm1748_vm1, %v1747_v2  ;;  %s1836_s9 = smul.u32 72, %s318_s8  ;;  %v539_v8 = vsel %vm370_vm0, %v1475_v6, 0  ;;  %v1480_v21 = vld [vmem:[%s2028_s4 + $0x8] sm:$0x3]  ;;  %v645_v26 = vsel %vm370_vm0, %v1482_v19, 0  ;;  %s2042_s7 = smov (!%p339_p6, %s338_s7), 15 }
  0x12   : > { %1572 = vmatprep.subr.bf16.mxu0 %v1747_v2  ;;  %1578 = vmatprep.subr.bf16.mxu1 %v1747_v2  ;;  %v596_v30 = vsel %vm370_vm0, %v1480_v21, 0  ;;  %v1487_v33 = vld [vmem:[%s2028_s4 + $0xe] sm:$0x3]  ;;  %v1484_v35 = vld [vmem:[%s2028_s4 + $0xc] sm:$0x3]  ;;  %s1463_s22 = sshll.u32 %s2042_s7, 2 }
  0x13   : > { %s326_s17 = scalar_lea.vmem %s2025_s1, %s1836_s9  ;;  %s321_s20 = scalar_lea.vmem %s2024_s0, %s1836_s9  ;;  %v767_v37 = vsel %vm370_vm0, %v1487_v33, 0  ;;  %v706_v38 = vsel %vm370_vm0, %v1484_v35, 0  ;;  %v1498_v43 = vld [vmem:[%s2028_s4 + $0x12] sm:$0x3]  ;;  %v1496_v45 = vld [vmem:[%s2028_s4 + $0x10] sm:$0x3] }
  0x14   : > { %s1856_s28 = scalar_lea.vmem %s326_s17, %s1839_s10  ;;  %s1859_s29 = scalar_lea.vmem %s321_s20, %s1839_s10  ;;  %v875_v49 = vsel %vm370_vm0, %v1498_v43, 0  ;;  %v826_v52 = vsel %vm370_vm0, %v1496_v45, 0  ;;  %v1503_v55 = vld [vmem:[%s2028_s4 + $0x16] sm:$0x3]  ;;  %v1500_v57 = vld [vmem:[%s2028_s4 + $0x14] sm:$0x3] }
  0x15   : > { %v361_v9 = vld [vmem:[%s1856_s28] sm:$0xf]  ;;  %v362_v10 = vld [vmem:[%s1856_s28 + $0x4] sm:$0x1]  ;;  %s336_s8 = scalar_lea.vmem %s2027_s3, %s1836_s9  ;;  %s331_s13 = scalar_lea.vmem %s2026_s2, %s1836_s9  ;;  %v1494_v47 = vld [vmem:[%s1856_s28 + $0x8] sm:$0xf] }
  0x16   : > { %v357_v11 = vld [vmem:[%s1859_s29] sm:$0xf]  ;;  %1563 = vmatmul.mubr.msk.bf16.vlgmr.msra.gmra.mxu0 %vm366_vm2, %v361_v9  ;;  %v1476_v12 = vcombine.low %v361_v9, %v362_v10  ;;  %v358_v13 = vld [vmem:[%s1859_s29 + $0x4] sm:$0x1]  ;;  %s1882_s14 = scalar_lea.vmem %s336_s8, %s1839_s10  ;;  %s1890_s16 = scalar_lea.vmem %s331_s13, %s1839_s10  ;;  %v1495_v48 = vld [vmem:[%s1856_s28 + $0xc] sm:$0x1] }
  0x17   : > { %1569 = vmatmul.mubr.msk.bf16.vlgmr.msra.gmra.mxu1 %vm366_vm2, %v357_v11  ;;  %v1473_v14 = vcombine.low %v357_v11, %v358_v13  ;;  %1573 = vmatpush3.bf16.msra.mxu0 %v478_v7  ;;  %v588_v23 = vld [vmem:[%s1882_s14] sm:$0xf]  ;;  %v589_v24 = vld [vmem:[%s1882_s14 + $0x4] sm:$0x1]  ;;  %v1491_v50 = vld [vmem:[%s1859_s29 + $0x8] sm:$0xf]  ;;  %v1504_v53 = vcombine.low %v1494_v47, %v1495_v48  ;;  %s342_s11 = scalar_lea.vmem %s2029_s5, %s1463_s22 }
  0x18   : > { %1579 = vmatpush3.bf16.msra.mxu1 %v539_v8  ;;  %v529_v15 = vshrl.u32 %v1476_v12, 16  ;;  %v531_v16 = vshll.u32 %v1476_v12, 16  ;;  %1574 = vmatprep.mubr.msk.bf16.mxu0 %vm1748_vm1, %v1747_v2  ;;  %v584_v27 = vld [vmem:[%s1890_s16] sm:$0xf]  ;;  %v585_v28 = vld [vmem:[%s1890_s16 + $0x4] sm:$0x1]  ;;  %v1488_v31 = vcombine.low %v588_v23, %v589_v24 }
  0x19   : > { %1580 = vmatprep.mubr.msk.bf16.mxu1 %vm1748_vm1, %v1747_v2  ;;  %v468_v17 = vshrl.u32 %v1473_v14, 16  ;;  %v470_v18 = vshll.u32 %v1473_v14, 16  ;;  %1584 = vmatprep.subr.bf16.mxu0 %v1747_v2  ;;  %v1485_v32 = vcombine.low %v584_v27, %v585_v28  ;;  %v1492_v51 = vld [vmem:[%s1859_s29 + $0xc] sm:$0x1]  ;;  %v989_v56 = vshll.u32 %v1504_v53, 16  ;;  %s1465_s12 = sshll.u32 %s2042_s7, 1 }
  0x1a   : > { %1590 = vmatprep.subr.bf16.mxu1 %v1747_v2  ;;  %v533_v20 = vrot.slane %v531_v16, 1  ;;  %v759_v34 = vshll.u32 %v1488_v31, 16  ;;  %v757_v39 = vshrl.u32 %v1488_v31, 16  ;;  %v1501_v54 = vcombine.low %v1491_v50, %v1492_v51  ;;  %v1514_v1 = vld [vmem:[%s2028_s4 + $0x1a] sm:$0x3]  ;;  %s350_s13 = scalar_lea.vmem %s2030_s6, %s1465_s12 }
  0x1b   : > { %v472_v22 = vrot.slane %v470_v18, 1  ;;  %v698_v36 = vshll.u32 %v1485_v32, 16  ;;  %v696_v41 = vshrl.u32 %v1485_v32, 16  ;;  %v997_v59 = vsel %vm370_vm0, %v1503_v55, 0  ;;  %v1512_v4 = vld [vmem:[%s2028_s4 + $0x18] sm:$0x3] }
  0x1c   : > { %v534_v25 = vor.u32 %v533_v20, %v529_v15  ;;  %v761_v40 = vrot.slane %v759_v34, 1  ;;  %v928_v58 = vshll.u32 %v1501_v54, 16  ;;  %v936_v60 = vsel %vm370_vm0, %v1500_v57, 0  ;;  %v1510_v6 = vld [vmem:[%s1882_s14 + $0x8] sm:$0xf] }
  0x1d   : > { %v473_v29 = vor.u32 %v472_v22, %v468_v17  ;;  %v700_v42 = vrot.slane %v698_v36, 1  ;;  %v987_v61 = vshrl.u32 %v1504_v53, 16  ;;  %v991_v62 = vrot.slane %v989_v56, 1  ;;  %v1511_v7 = vld [vmem:[%s1882_s14 + $0xc] sm:$0x1] }
  0x1e   : > { %v762_v44 = vor.u32 %v761_v40, %v757_v39  ;;  %v926_v63 = vshrl.u32 %v1501_v54, 16  ;;  %v930_v0 = vrot.slane %v928_v58, 1  ;;  %v1103_v8 = vsel %vm370_vm0, %v1514_v1, 0  ;;  %v1507_v9 = vld [vmem:[%s1890_s16 + $0x8] sm:$0xf] }
  0x1f   : > { %1581 = vmatmul.mubr.msk.bf16.vlgmr.msra.gmra.mxu1 %vm366_vm2, %v534_v25  ;;  %1575 = vmatmul.mubr.msk.bf16.vlgmr.msra.gmra.mxu0 %vm366_vm2, %v473_v29  ;;  %v701_v46 = vor.u32 %v700_v42, %v696_v41  ;;  %v992_v3 = vor.u32 %v991_v62, %v987_v61  ;;  %v1508_v10 = vld [vmem:[%s1890_s16 + $0xc] sm:$0x1]  ;;  %v1054_v11 = vsel %vm370_vm0, %v1512_v4, 0  ;;  %v1520_v12 = vcombine.low %v1510_v6, %v1511_v7  ;;  %v1519_v14 = vld [vmem:[%s2028_s4 + $0x1e] sm:$0x3] }
  0x20   : > { %1591 = vmatpush3.bf16.msra.mxu1 %v645_v26  ;;  %1585 = vmatpush3.bf16.msra.mxu0 %v596_v30  ;;  %v931_v5 = vor.u32 %v930_v0, %v926_v63  ;;  %v1517_v13 = vcombine.low %v1507_v9, %v1508_v10  ;;  %v1516_v16 = vld [vmem:[%s2028_s4 + $0x1c] sm:$0x3]  ;;  %v1225_v18 = vsel %vm370_vm0, %v1519_v14, 0 }
  0x21   : > { %1586 = vmatprep.mubr.msk.bf16.mxu0 %vm1748_vm1, %v1747_v2  ;;  %1592 = vmatprep.mubr.msk.bf16.mxu1 %vm1748_vm1, %v1747_v2  ;;  %v1217_v15 = vshll.u32 %v1520_v12, 16  ;;  %v1164_v19 = vsel %vm370_vm0, %v1516_v16, 0  ;;  %v1215_v20 = vshrl.u32 %v1520_v12, 16 }
  0x22   : > { %1596 = vmatprep.subr.bf16.mxu0 %v1747_v2  ;;  %1602 = vmatprep.subr.bf16.mxu1 %v1747_v2  ;;  %v1156_v17 = vshll.u32 %v1517_v13, 16  ;;  %v1154_v22 = vshrl.u32 %v1517_v13, 16 }
  0x23   : > { %v1219_v21 = vrot.slane %v1217_v15, 1 }
  0x25   : > { %v1220_v24 = vor.u32 %v1219_v21, %v1215_v20 }
  0x27   : > { %1593 = vmatmul.mubr.msk.bf16.vlgmr.msra.gmra.mxu1 %vm366_vm2, %v588_v23  ;;  %1587 = vmatmul.mubr.msk.bf16.vlgmr.msra.gmra.mxu0 %vm366_vm2, %v584_v27  ;;  %v1158_v23 = vrot.slane %v1156_v17, 1 }
  0x28   : > { %1603 = vmatpush3.bf16.msra.mxu1 %v767_v37  ;;  %1597 = vmatpush3.bf16.msra.mxu0 %v706_v38 }
  0x29   : > { %1598 = vmatprep.mubr.msk.bf16.mxu0 %vm1748_vm1, %v1747_v2  ;;  %1604 = vmatprep.mubr.msk.bf16.mxu1 %vm1748_vm1, %v1747_v2  ;;  %v1159_v25 = vor.u32 %v1158_v23, %v1154_v22 }
  0x2a   : > { %1608 = vmatprep.subr.bf16.mxu0 %v1747_v2  ;;  %1614 = vmatprep.subr.bf16.mxu1 %v1747_v2 }
  0x2f   : > { %1605 = vmatmul.mubr.msk.bf16.vlgmr.msra.gmra.mxu1 %vm366_vm2, %v762_v44  ;;  %1599 = vmatmul.mubr.msk.bf16.vlgmr.msra.gmra.mxu0 %vm366_vm2, %v701_v46 }
  0x30   : > { %1615 = vmatpush3.bf16.msra.mxu1 %v875_v49  ;;  %1609 = vmatpush3.bf16.msra.mxu0 %v826_v52 }
  0x31   : > { %1610 = vmatprep.mubr.msk.bf16.mxu0 %vm1748_vm1, %v1747_v2  ;;  %1616 = vmatprep.mubr.msk.bf16.mxu1 %vm1748_vm1, %v1747_v2 }
  0x32   : > { %1620 = vmatprep.subr.bf16.mxu0 %v1747_v2  ;;  %1626 = vmatprep.subr.bf16.mxu1 %v1747_v2 }
  0x37   : > { %1617 = vmatmul.mubr.msk.bf16.vlgmr.msra.gmra.mxu1 %vm366_vm2, %v1494_v47  ;;  %1611 = vmatmul.mubr.msk.bf16.vlgmr.msra.gmra.mxu0 %vm366_vm2, %v1491_v50 }
  0x38   : > { %1627 = vmatpush3.bf16.msra.mxu1 %v997_v59  ;;  %1621 = vmatpush3.bf16.msra.mxu0 %v936_v60 }
  0x39   : > { %1622 = vmatprep.mubr.msk.bf16.mxu0 %vm1748_vm1, %v1747_v2  ;;  %1628 = vmatprep.mubr.msk.bf16.mxu1 %vm1748_vm1, %v1747_v2 }
  0x3a   : > { %1632 = vmatprep.subr.bf16.mxu0 %v1747_v2  ;;  %1638 = vmatprep.subr.bf16.mxu1 %v1747_v2 }
  0x3f   : > { %1629 = vmatmul.mubr.msk.bf16.vlgmr.msra.gmra.mxu1 %vm366_vm2, %v992_v3  ;;  %1623 = vmatmul.mubr.msk.bf16.vlgmr.msra.gmra.mxu0 %vm366_vm2, %v931_v5 }
  0x40   : > { %1639 = vmatpush3.bf16.msra.mxu1 %v1103_v8  ;;  %1633 = vmatpush3.bf16.msra.mxu0 %v1054_v11 }
  0x41   : > { %1634 = vmatprep.mubr.msk.bf16.mxu0 %vm1748_vm1, %v1747_v2  ;;  %1640 = vmatprep.mubr.msk.bf16.mxu1 %vm1748_vm1, %v1747_v2 }
  0x42   : > { %1644 = vmatprep.subr.bf16.mxu0 %v1747_v2  ;;  %1650 = vmatprep.subr.bf16.mxu1 %v1747_v2 }
  0x47   : > { %1641 = vmatmul.mubr.msk.bf16.vlgmr.msra.gmra.mxu1 %vm366_vm2, %v1510_v6  ;;  %1635 = vmatmul.mubr.msk.bf16.vlgmr.msra.gmra.mxu0 %vm366_vm2, %v1507_v9 }
  0x48   : > { %1651 = vmatpush3.bf16.msra.mxu1 %v1225_v18  ;;  %1645 = vmatpush3.bf16.msra.mxu0 %v1164_v19 }
  0x49   : > { %1646 = vmatprep.mubr.msk.bf16.mxu0 %vm1748_vm1, %v1747_v2  ;;  %1652 = vmatprep.mubr.msk.bf16.mxu1 %vm1748_vm1, %v1747_v2 }
  0x4f   : > { %1653 = vmatmul.mubr.msk.bf16.vlgmr.msra.gmra.mxu1 %vm366_vm2, %v1220_v24  ;;  %1647 = vmatmul.mubr.msk.bf16.vlgmr.msra.gmra.mxu0 %vm366_vm2, %v1159_v25 }
  0xd6   : > { %v408_v26 = vpop.f32.mrf.mxu0 }
  0xd7   : > { %v454_v27 = vpop.f32.mrf.mxu1 }
  0xd8   : > { %v1564_v28 = vpop.f32.mrf.mxu0  ;;  %v455_v45 = vadd.f32 %v454_v27, %v408_v26 }
  0xd9   : > { %v1570_v29 = vpop.f32.mrf.mxu1 }
  0xda   : > { %v411_v30 = vpop.f32.mrf.mxu0 }
  0xdb   : > { %v457_v31 = vpop.f32.mrf.mxu1 }
  0xdc   : > { %v1565_v32 = vpop.f32.mrf.mxu0 }
  0xdd   : > { %v1571_v33 = vpop.f32.mrf.mxu1 }
  0xdf   : > { %v575_v34 = vpop.f32.mrf.mxu1  ;;  %v514_v35 = vpop.f32.mrf.mxu0 }
  0xe0   : > { %v520_v48 = vadd.f32 %v514_v35, %v455_v45 }
  0xe1   : > { %v1582_v36 = vpop.f32.mrf.mxu1  ;;  %v1576_v37 = vpop.f32.mrf.mxu0 }
  0xe2   : > { %v581_v53 = vadd.f32 %v575_v34, %v520_v48 }
  0xe3   : > { %v578_v38 = vpop.f32.mrf.mxu1  ;;  %v517_v2 = vpop.f32.mrf.mxu0 }
  0xe5   : > { %v1583_v39 = vpop.f32.mrf.mxu1  ;;  %v1577_v40 = vpop.f32.mrf.mxu0 }
  0xe7   : > { %v681_v41 = vpop.f32.mrf.mxu1  ;;  %v632_v42 = vpop.f32.mrf.mxu0 }
  0xe8   : > { %v638_v56 = vadd.f32 %v632_v42, %v581_v53 }
  0xe9   : > { %v1594_v43 = vpop.f32.mrf.mxu1  ;;  %v1588_v44 = vpop.f32.mrf.mxu0 }
  0xea   : > { %v687_v61 = vadd.f32 %v681_v41, %v638_v56 }
  0xeb   : > { %v684_v46 = vpop.f32.mrf.mxu1  ;;  %v635_v47 = vpop.f32.mrf.mxu0 }
  0xed   : > { %v1595_v49 = vpop.f32.mrf.mxu1  ;;  %v1589_v50 = vpop.f32.mrf.mxu0 }
  0xef   : > { %v803_v51 = vpop.f32.mrf.mxu1  ;;  %v742_v52 = vpop.f32.mrf.mxu0 }
  0xf0   : > { %v748_v0 = vadd.f32 %v742_v52, %v687_v61 }
  0xf1   : > { %v1606_v54 = vpop.f32.mrf.mxu1  ;;  %v1600_v55 = vpop.f32.mrf.mxu0 }
  0xf2   : > { %v809_v6 = vadd.f32 %v803_v51, %v748_v0 }
  0xf3   : > { %v806_v57 = vpop.f32.mrf.mxu1  ;;  %v745_v58 = vpop.f32.mrf.mxu0 }
  0xf5   : > { %v1607_v59 = vpop.f32.mrf.mxu1  ;;  %v1601_v60 = vpop.f32.mrf.mxu0 }
  0xf7   : > { %v911_v62 = vpop.f32.mrf.mxu1  ;;  %v862_v63 = vpop.f32.mrf.mxu0 }
  0xf8   : > { %v868_v9 = vadd.f32 %v862_v63, %v809_v6 }
  0xf9   : > { %v1618_v1 = vpop.f32.mrf.mxu1  ;;  %v1612_v3 = vpop.f32.mrf.mxu0 }
  0xfa   : > { %v917_v14 = vadd.f32 %v911_v62, %v868_v9 }
  0xfb   : > { %v914_v4 = vpop.f32.mrf.mxu1  ;;  %v865_v5 = vpop.f32.mrf.mxu0 }
  0xfd   : > { %v1619_v7 = vpop.f32.mrf.mxu1  ;;  %v1613_v8 = vpop.f32.mrf.mxu0 }
  0xff   : > { %v1033_v10 = vpop.f32.mrf.mxu1  ;;  %v972_v11 = vpop.f32.mrf.mxu0 }
 0x100   : > { %v978_v17 = vadd.f32 %v972_v11, %v917_v14 }
 0x101   : > { %v1630_v12 = vpop.f32.mrf.mxu1  ;;  %v1624_v13 = vpop.f32.mrf.mxu0 }
 0x102   : > { %v1039_v22 = vadd.f32 %v1033_v10, %v978_v17 }
 0x103   : > { %v1036_v15 = vpop.f32.mrf.mxu1  ;;  %v975_v16 = vpop.f32.mrf.mxu0 }
 0x105   : > { %v1631_v18 = vpop.f32.mrf.mxu1  ;;  %v1625_v19 = vpop.f32.mrf.mxu0 }
 0x107   : > { %v1139_v20 = vpop.f32.mrf.mxu1  ;;  %v1090_v21 = vpop.f32.mrf.mxu0 }
 0x108   : > { %v1096_v25 = vadd.f32 %v1090_v21, %v1039_v22 }
 0x109   : > { %v1642_v23 = vpop.f32.mrf.mxu1  ;;  %v1636_v24 = vpop.f32.mrf.mxu0 }
 0x10a   : > { %v1145_v30 = vadd.f32 %v1139_v20, %v1096_v25 }
 0x10b   : > { %v1142_v26 = vpop.f32.mrf.mxu1  ;;  %v1093_v27 = vpop.f32.mrf.mxu0 }
 0x10d   : > { %v1643_v28 = vpop.f32.mrf.mxu1  ;;  %v1637_v29 = vpop.f32.mrf.mxu0 }
 0x10f   : > { %v1261_v31 = vpop.f32.mrf.mxu1  ;;  %v1200_v32 = vpop.f32.mrf.mxu0 }
 0x110   : > { %v1206_v33 = vadd.f32 %v1200_v32, %v1145_v30 }
 0x111   : > { %v1654_v34 = vpop.f32.mrf.mxu1  ;;  %v1648_v35 = vpop.f32.mrf.mxu0 }
 0x112   : > { %v1267_v36 = vadd.f32 %v1261_v31, %v1206_v33 }
 0x113   : > { %v1264_v37 = vpop.f32.mrf.mxu1  ;;  %v1203_v38 = vpop.f32.mrf.mxu0 }
 0x114   : > { %v1268_v2 = vpack.c.bf16 %v1267_v36, %v1267_v36  ;;  %v1270_v39 = vrot.slane %v1267_v36, 4  ;;  %v1277_v40 = vmul.f32 %v1267_v36, %v1267_v36 }
 0x115   : > { %v1655_v41 = vpop.f32.mrf.mxu1  ;;  %v1649_v42 = vpop.f32.mrf.mxu0 }
 0x116   : > { %1269 = vst [vmem:[%s342_s11] sm:$0xf] %v1268_v2  ;;  %v1271_v43 = vadd.f32 %v1270_v39, %v1267_v36  ;;  %v1278_v44 = vrot.slane %v1277_v40, 4 }
 0x118   : > { %v1272_v45 = vrot.slane %v1271_v43, 2  ;;  %v1279_v46 = vadd.f32 %v1278_v44, %v1277_v40 }
 0x11a   : > { %v1273_v47 = vadd.f32 %v1272_v45, %v1271_v43  ;;  %v1280_v48 = vrot.slane %v1279_v46, 2 }
 0x11c   : > { %v1274_v49 = vrot.slane %v1273_v47, 1  ;;  %v1281_v50 = vadd.f32 %v1280_v48, %v1279_v46 }
 0x11e   : > { %v1275_v51 = vadd.f32 %v1274_v49, %v1273_v47  ;;  %v1282_v52 = vrot.slane %v1281_v50, 1 }
 0x120   : > { %1276 = vst [vmem:[%s350_s13] sm:$0x1] %v1275_v51  ;;  %v1283_v53 = vadd.f32 %v1282_v52, %v1281_v50 }
 0x122   : > { %1284 = vst [vmem:[%s350_s13 + $0x1] sm:$0x1] %v1283_v53 }
 0x123 PF: > { %s17_s25 = sadd.s32 1, %s1745_s25   ;;  %s2031_s21 = smov %s1737_s23 }
 0x124   : > { %p14_p7 = scmp.ge.s32.totalorder %s17_s25, 18   ;;  %s2032_s22 = smov %s1741_s24 }
 0x125   : > { %s2033_s23 = smov %s2036_s26  ;;  %s2034_s24 = smov %s2040_s27 }
 0x126   :  { %16 = sbr.rel (!%p14_p7) target bundleno = 3 (0x3), region = 114 }

</bundles_post_ra>
